<compile_context>
chip_gen: v7x
topology: tpu7x:2x2x1
jax: 0.10.0
libtpu: 0.0.40
codegen_flags: <defaults>
</compile_context>

<pallas_src>
import jax
import jax.numpy as jnp
from jax.experimental import pallas as pl
from jax.experimental.pallas import tpu as pltpu

HD = 3
VOCAB_SIZE = 32
EMBEDDING_DIM = 8
CONTEXT_SIZE = 2

# Lane-dense padded sizes (last-dim multiples of 128).
HD_PAD = 128
VOCAB_PAD = 128

B_TILE = 128  # rows of contexts per grid step


def ngram_kernel(idx_ref, emb_ref, w1_ref, b1_ref, w2_ref, b2_ref, out_ref):
    """One grid step = B_TILE independent n-gram forwards.

    idx_ref : VMEM int32 (B_TILE, CONTEXT_SIZE)              -- token indices
    emb_ref : VMEM f32  (VOCAB_SIZE, EMBEDDING_DIM)          -- grid-invariant
    w1_ref  : VMEM f32  (CONTEXT*EMB, HD_PAD)                -- grid-invariant, zero-padded cols
    b1_ref  : VMEM f32  (1, HD_PAD)
    w2_ref  : VMEM f32  (HD_PAD, VOCAB_PAD)                  -- zero-padded rows/cols
    b2_ref  : VMEM f32  (1, VOCAB_PAD)
    out_ref : VMEM f32  (B_TILE, VOCAB_PAD)                  -- log-probs (padded lanes masked)
    """
    bt = idx_ref.shape[0]
    idx = idx_ref[...]                                        # (B_TILE, CONTEXT)

    # linear1 over the concatenated embeddings, expressed as a per-context-slot sum:
    #   acc += onehot(idx[:, i]) @ emb @ W1[i*E:(i+1)*E, :]
    # One-hot gather keeps the row gather on the MXU instead of chained dynamic loads.
    acc = jnp.zeros((bt, HD_PAD), jnp.float32)
    vocab_iota = jax.lax.broadcasted_iota(jnp.int32, (bt, VOCAB_SIZE), 1)
    for i in range(CONTEXT_SIZE):                             # static unroll (CONTEXT_SIZE=2)
        ids = idx[:, i:i + 1]                                 # (B_TILE, 1)
        onehot = (vocab_iota == ids).astype(jnp.float32)      # (B_TILE, VOCAB)
        emb_i = jnp.dot(onehot, emb_ref[...],
                        preferred_element_type=jnp.float32)   # (B_TILE, EMB)
        w1_i = w1_ref[pl.ds(i * EMBEDDING_DIM, EMBEDDING_DIM), :]   # (EMB, HD_PAD)
        acc = acc + jnp.dot(emb_i, w1_i, preferred_element_type=jnp.float32)

    h = jnp.maximum(acc + b1_ref[...], 0.0)                   # ReLU, (B_TILE, HD_PAD)
    logits = jnp.dot(h, w2_ref[...],
                     preferred_element_type=jnp.float32) + b2_ref[...]   # (B_TILE, VOCAB_PAD)

    # Mask padded vocab lanes so they do not contribute to log_softmax.
    lane = jax.lax.broadcasted_iota(jnp.int32, logits.shape, 1)
    logits = jnp.where(lane < VOCAB_SIZE, logits, -1e30)

    # Numerically stable log_softmax along dim=1.
    m = jnp.max(logits, axis=1, keepdims=True)
    shifted = logits - m
    lse = jnp.log(jnp.sum(jnp.exp(shifted), axis=1, keepdims=True))
    out_ref[...] = (shifted - lse).astype(out_ref.dtype)


def ngram_forward(indices, emb, w1, b1, w2, b2):
    """Batched forward: indices (B, CONTEXT_SIZE) int32 -> (B, VOCAB_SIZE) log-probs.

    Also accepts a single context of shape (CONTEXT_SIZE,) (original module semantics).
    """
    indices = jnp.atleast_2d(indices).astype(jnp.int32)       # (B, CONTEXT)
    B = indices.shape[0]
    B_padded = ((B + B_TILE - 1) // B_TILE) * B_TILE
    if B_padded != B:
        indices = jnp.pad(indices, ((0, B_padded - B), (0, 0)))

    # Pad params to lane-dense layouts (zeros; padded vocab lanes masked in-kernel).
    w1_p = jnp.zeros((CONTEXT_SIZE * EMBEDDING_DIM, HD_PAD), jnp.float32).at[:, :HD].set(w1)
    b1_p = jnp.zeros((1, HD_PAD), jnp.float32).at[:, :HD].set(b1)
    w2_p = jnp.zeros((HD_PAD, VOCAB_PAD), jnp.float32).at[:HD, :VOCAB_SIZE].set(w2)
    b2_p = jnp.zeros((1, VOCAB_PAD), jnp.float32).at[:, :VOCAB_SIZE].set(b2)

    const = lambda b: (0, 0)   # weights/biases: same block every step -> DMA'd once, VMEM-resident

    # NOTE: for a realistic vocab/embedding (e.g. 50k x 512) the table should stay in HBM
    # (memory_space=pl.ANY) and rows gathered via DMA; at 32x8 it trivially fits VMEM.
    out = pl.pallas_call(
        ngram_kernel,
        out_shape=jax.ShapeDtypeStruct((B_padded, VOCAB_PAD), jnp.float32),
        grid=(B_padded // B_TILE,),
        in_specs=[
            pl.BlockSpec((B_TILE, CONTEXT_SIZE), lambda b: (b, 0)),        # indices
            pl.BlockSpec((VOCAB_SIZE, EMBEDDING_DIM), const),              # embedding table
            pl.BlockSpec((CONTEXT_SIZE * EMBEDDING_DIM, HD_PAD), const),   # W1 (padded)
            pl.BlockSpec((1, HD_PAD), const),                              # b1 (padded)
            pl.BlockSpec((HD_PAD, VOCAB_PAD), const),                      # W2 (padded)
            pl.BlockSpec((1, VOCAB_PAD), const),                           # b2 (padded)
        ],
        out_specs=pl.BlockSpec((B_TILE, VOCAB_PAD), lambda b: (b, 0)),
        compiler_params=pltpu.CompilerParams(
            dimension_semantics=("parallel",)),   # shard batch tiles across TCs (v7x)
    )(indices, emb, w1_p, b1_p, w2_p, b2_p)

    return out[:B, :VOCAB_SIZE]


def ngram_reference(indices, emb, w1, b1, w2, b2):
    indices = jnp.atleast_2d(indices)
    embeds = emb[indices].reshape(indices.shape[0], -1)       # (B, CONTEXT*EMB)
    h = jnp.maximum(embeds @ w1 + b1, 0.0)
    logits = h @ w2 + b2
    return jax.nn.log_softmax(logits, axis=1)


if __name__ == "__main__":
    key = jax.random.PRNGKey(0)
    k_emb, k_w1, k_b1, k_w2, k_b2, k_idx = jax.random.split(key, 6)

    # Deterministic synthetic parameters (module __init__ shapes, transposed linears).
    emb = jax.random.normal(k_emb, (VOCAB_SIZE, EMBEDDING_DIM), jnp.float32) * 0.1
    w1 = jax.random.normal(k_w1, (CONTEXT_SIZE * EMBEDDING_DIM, HD), jnp.float32) * 0.1
    b1 = jax.random.normal(k_b1, (1, HD), jnp.float32) * 0.1
    w2 = jax.random.normal(k_w2, (HD, VOCAB_SIZE), jnp.float32) * 0.1
    b2 = jax.random.normal(k_b2, (1, VOCAB_SIZE), jnp.float32) * 0.1

    # Batched n-gram contexts (each row = one forward of the original module).
    B = 256
    indices = jax.random.randint(k_idx, (B, CONTEXT_SIZE), 0, VOCAB_SIZE, dtype=jnp.int32)

    log_probs = ngram_forward(indices, emb, w1, b1, w2, b2)
    jax.block_until_ready(log_probs)

    ref = ngram_reference(indices, emb, w1, b1, w2, b2)
    assert log_probs.shape == (B, VOCAB_SIZE)
    assert jnp.allclose(log_probs, ref, atol=1e-5, rtol=1e-5), "batched mismatch vs JAX reference"

    # Original single-example semantics: one context -> (1, vocab) log-probs.
    single_idx = jnp.array([3, 7], dtype=jnp.int32)
    single = ngram_forward(single_idx, emb, w1, b1, w2, b2)
    single_ref = ngram_reference(single_idx, emb, w1, b1, w2, b2)
    assert single.shape == (1, VOCAB_SIZE)
    assert jnp.allclose(single, single_ref, atol=1e-5, rtol=1e-5), "single-example mismatch"

    print("KERNEL_OK")
</pallas_src>

<mosaic_0001>
module attributes {stable_mosaic.version = 11 : i64} {
  func.func @ngram_kernel(%arg0: i32, %arg1: memref<128x2xi32, #tpu.memory_space<vmem>>, %arg2: memref<32x8xf32, #tpu.memory_space<vmem>>, %arg3: memref<16x128xf32, #tpu.memory_space<vmem>>, %arg4: memref<1x128xf32, #tpu.memory_space<vmem>>, %arg5: memref<128x128xf32, #tpu.memory_space<vmem>>, %arg6: memref<1x128xf32, #tpu.memory_space<vmem>>, %arg7: memref<128x128xf32, #tpu.memory_space<vmem>>) attributes {dimension_semantics = [#tpu.dimension_semantics<parallel>], iteration_bounds = array<i64: 2>, scalar_prefetch = 0 : i64, scratch_operands = 0 : i64, tpu.core_type = #tpu.core_type<tc>, window_params = [{transform_indices = @transform_0, window_bounds = array<i64: 128, 2>}, {pipeline_mode = #tpu.pipeline_mode<synchronous>, transform_indices = @transform_1, window_bounds = array<i64: 32, 8>}, {pipeline_mode = #tpu.pipeline_mode<synchronous>, transform_indices = @transform_2, window_bounds = array<i64: 16, 128>}, {pipeline_mode = #tpu.pipeline_mode<synchronous>, transform_indices = @transform_3, window_bounds = array<i64: 1, 128>}, {pipeline_mode = #tpu.pipeline_mode<synchronous>, transform_indices = @transform_4, window_bounds = array<i64: 128, 128>}, {pipeline_mode = #tpu.pipeline_mode<synchronous>, transform_indices = @transform_5, window_bounds = array<i64: 1, 128>}, {transform_indices = @transform_6, window_bounds = array<i64: 128, 128>}]} {
    %c0 = arith.constant 0 : index
    %c0_0 = arith.constant 0 : index
    %0 = vector.load %arg1[%c0, %c0_0] : memref<128x2xi32, #tpu.memory_space<vmem>>, vector<128x2xi32>
    %cst = arith.constant 0.000000e+00 : f32
    %1 = vector.broadcast %cst : f32 to vector<128x128xf32>
    %2 = tpu.iota {dimensions = array<i32: 1>} : vector<128x32xi32>
    %3 = vector.extract_strided_slice %0 {offsets = [0, 0], sizes = [128, 1], strides = [1, 1]} : vector<128x2xi32> to vector<128x1xi32>
    %4 = vector.broadcast %3 : vector<128x1xi32> to vector<128x32xi32>
    %5 = arith.cmpi eq, %2, %4 : vector<128x32xi32>
    %6 = arith.extui %5 : vector<128x32xi1> to vector<128x32xi32>
    %7 = arith.sitofp %6 : vector<128x32xi32> to vector<128x32xf32>
    %c0_1 = arith.constant 0 : index
    %c0_2 = arith.constant 0 : index
    %8 = vector.load %arg2[%c0_1, %c0_2] : memref<32x8xf32, #tpu.memory_space<vmem>>, vector<32x8xf32>
    %cst_3 = arith.constant dense<0.000000e+00> : vector<128x8xf32>
    %9 = tpu.matmul %7, %8, %cst_3 {dimension_numbers = #tpu.dot_dimension_numbers<[1], [0], [0], [1], [0, 0, 1, 1], [], []>} : vector<128x32xf32>, vector<32x8xf32>, vector<128x8xf32> -> vector<128x8xf32>
    %c0_4 = arith.constant 0 : index
    %c0_5 = arith.constant 0 : index
    %10 = vector.load %arg3[%c0_4, %c0_5] : memref<16x128xf32, #tpu.memory_space<vmem>>, vector<8x128xf32>
    %cst_6 = arith.constant dense<0.000000e+00> : vector<128x128xf32>
    %11 = tpu.matmul %9, %10, %cst_6 {dimension_numbers = #tpu.dot_dimension_numbers<[1], [0], [0], [1], [0, 0, 1, 1], [], []>} : vector<128x8xf32>, vector<8x128xf32>, vector<128x128xf32> -> vector<128x128xf32>
    %12 = arith.addf %1, %11 : vector<128x128xf32>
    %13 = vector.extract_strided_slice %0 {offsets = [0, 1], sizes = [128, 1], strides = [1, 1]} : vector<128x2xi32> to vector<128x1xi32>
    %14 = vector.broadcast %13 : vector<128x1xi32> to vector<128x32xi32>
    %15 = arith.cmpi eq, %2, %14 : vector<128x32xi32>
    %16 = arith.extui %15 : vector<128x32xi1> to vector<128x32xi32>
    %17 = arith.sitofp %16 : vector<128x32xi32> to vector<128x32xf32>
    %c0_7 = arith.constant 0 : index
    %c0_8 = arith.constant 0 : index
    %18 = vector.load %arg2[%c0_7, %c0_8] : memref<32x8xf32, #tpu.memory_space<vmem>>, vector<32x8xf32>
    %cst_9 = arith.constant dense<0.000000e+00> : vector<128x8xf32>
    %19 = tpu.matmul %17, %18, %cst_9 {dimension_numbers = #tpu.dot_dimension_numbers<[1], [0], [0], [1], [0, 0, 1, 1], [], []>} : vector<128x32xf32>, vector<32x8xf32>, vector<128x8xf32> -> vector<128x8xf32>
    %c8 = arith.constant 8 : index
    %c0_10 = arith.constant 0 : index
    %20 = vector.load %arg3[%c8, %c0_10] : memref<16x128xf32, #tpu.memory_space<vmem>>, vector<8x128xf32>
    %cst_11 = arith.constant dense<0.000000e+00> : vector<128x128xf32>
    %21 = tpu.matmul %19, %20, %cst_11 {dimension_numbers = #tpu.dot_dimension_numbers<[1], [0], [0], [1], [0, 0, 1, 1], [], []>} : vector<128x8xf32>, vector<8x128xf32>, vector<128x128xf32> -> vector<128x128xf32>
    %22 = arith.addf %12, %21 : vector<128x128xf32>
    %c0_12 = arith.constant 0 : index
    %c0_13 = arith.constant 0 : index
    %23 = vector.load %arg4[%c0_12, %c0_13] : memref<1x128xf32, #tpu.memory_space<vmem>>, vector<1x128xf32>
    %24 = vector.broadcast %23 : vector<1x128xf32> to vector<128x128xf32>
    %25 = arith.addf %22, %24 : vector<128x128xf32>
    %cst_14 = arith.constant 0.000000e+00 : f32
    %26 = vector.broadcast %cst_14 : f32 to vector<128x128xf32>
    %27 = arith.maximumf %25, %26 : vector<128x128xf32>
    %c0_15 = arith.constant 0 : index
    %c0_16 = arith.constant 0 : index
    %28 = vector.load %arg5[%c0_15, %c0_16] : memref<128x128xf32, #tpu.memory_space<vmem>>, vector<128x128xf32>
    %cst_17 = arith.constant dense<0.000000e+00> : vector<128x128xf32>
    %29 = tpu.matmul %27, %28, %cst_17 {dimension_numbers = #tpu.dot_dimension_numbers<[1], [0], [0], [1], [0, 0, 1, 1], [], []>} : vector<128x128xf32>, vector<128x128xf32>, vector<128x128xf32> -> vector<128x128xf32>
    %c0_18 = arith.constant 0 : index
    %c0_19 = arith.constant 0 : index
    %30 = vector.load %arg6[%c0_18, %c0_19] : memref<1x128xf32, #tpu.memory_space<vmem>>, vector<1x128xf32>
    %31 = vector.broadcast %30 : vector<1x128xf32> to vector<128x128xf32>
    %32 = arith.addf %29, %31 : vector<128x128xf32>
    %33 = tpu.iota {dimensions = array<i32: 1>} : vector<128x128xi32>
    %c32_i32 = arith.constant 32 : i32
    %34 = vector.broadcast %c32_i32 : i32 to vector<128x128xi32>
    %35 = arith.cmpi slt, %33, %34 : vector<128x128xi32>
    %cst_20 = arith.constant -1.000000e+30 : f32
    %36 = vector.broadcast %cst_20 : f32 to vector<128x128xf32>
    %37 = arith.select %35, %32, %36 : vector<128x128xi1>, vector<128x128xf32>
    %cst_21 = arith.constant dense<0xFF800000> : vector<128xf32>
    %38 = vector.multi_reduction <maximumf>, %37, %cst_21 [1] : vector<128x128xf32> to vector<128xf32>
    %39 = vector.shape_cast %38 : vector<128xf32> to vector<128x1xf32>
    %40 = vector.broadcast %39 : vector<128x1xf32> to vector<128x128xf32>
    %41 = arith.subf %37, %40 : vector<128x128xf32>
    %42 = math.exp %41 : vector<128x128xf32>
    %cst_22 = arith.constant dense<0.000000e+00> : vector<128xf32>
    %43 = vector.multi_reduction <add>, %42, %cst_22 [1] : vector<128x128xf32> to vector<128xf32>
    %44 = vector.shape_cast %43 : vector<128xf32> to vector<128x1xf32>
    %45 = math.log %44 : vector<128x1xf32>
    %46 = vector.broadcast %45 : vector<128x1xf32> to vector<128x128xf32>
    %47 = arith.subf %41, %46 : vector<128x128xf32>
    %c0_23 = arith.constant 0 : index
    %c0_24 = arith.constant 0 : index
    %48 = vector.load %arg7[%c0_23, %c0_24] : memref<128x128xf32, #tpu.memory_space<vmem>>, vector<128x128xf32>
    tpu.vector_store %arg7[%c0_23, %c0_24], %47 {strides = array<i32>} : memref<128x128xf32, #tpu.memory_space<vmem>>, vector<128x128xf32>,
    return
  }
  func.func @transform_0(%arg0: i32) -> (i32, i32) {
    %c0_i32 = arith.constant 0 : i32
    %c0_i32_0 = arith.constant 0 : i32
    return %arg0, %c0_i32 : i32, i32
  }
  func.func @transform_1(%arg0: i32) -> (i32, i32) {
    %c0_i32 = arith.constant 0 : i32
    %c0_i32_0 = arith.constant 0 : i32
    %c0_i32_1 = arith.constant 0 : i32
    return %c0_i32, %c0_i32_0 : i32, i32
  }
  func.func @transform_2(%arg0: i32) -> (i32, i32) {
    %c0_i32 = arith.constant 0 : i32
    %c0_i32_0 = arith.constant 0 : i32
    %c0_i32_1 = arith.constant 0 : i32
    return %c0_i32, %c0_i32_0 : i32, i32
  }
  func.func @transform_3(%arg0: i32) -> (i32, i32) {
    %c0_i32 = arith.constant 0 : i32
    %c0_i32_0 = arith.constant 0 : i32
    %c0_i32_1 = arith.constant 0 : i32
    return %c0_i32, %c0_i32_0 : i32, i32
  }
  func.func @transform_4(%arg0: i32) -> (i32, i32) {
    %c0_i32 = arith.constant 0 : i32
    %c0_i32_0 = arith.constant 0 : i32
    %c0_i32_1 = arith.constant 0 : i32
    return %c0_i32, %c0_i32_0 : i32, i32
  }
  func.func @transform_5(%arg0: i32) -> (i32, i32) {
    %c0_i32 = arith.constant 0 : i32
    %c0_i32_0 = arith.constant 0 : i32
    %c0_i32_1 = arith.constant 0 : i32
    return %c0_i32, %c0_i32_0 : i32, i32
  }
  func.func @transform_6(%arg0: i32) -> (i32, i32) {
    %c0_i32 = arith.constant 0 : i32
    %c0_i32_0 = arith.constant 0 : i32
    return %arg0, %c0_i32 : i32, i32
  }
}

</mosaic_0001>

<bundles_post_ra>
// kernel: tpu_custom_call.1
= control target key start
LH: loop header
LB: loop body
LE: loop exit
PB: predicated region body
PF: predicated region fallthrough
CT: control target
= control target key end

     0   :  { %11 = vsyncpa [#allocation3], 0  ;;  %s2886_s0 = inlined_call_operand.vmem [shape: s32[256,2], index: 0, kind: input, shape index: {}]   ;;  %s2887_s1 = inlined_call_operand.vmem [shape: f32[32,8], index: 1, kind: input, shape index: {}]   ;;  %s2888_s2 = inlined_call_operand.vmem [shape: f32[16,128], index: 2, kind: input, shape index: {}]   ;;  %s2889_s3 = inlined_call_operand.vmem [shape: f32[1,128], index: 3, kind: input, shape index: {}]   ;;  %s2890_s4 = inlined_call_operand.vmem [shape: f32[128,128], index: 4, kind: input, shape index: {}]   ;;  %s2891_s5 = inlined_call_operand.vmem [shape: f32[1,128], index: 5, kind: input, shape index: {}]   ;;  %s2892_s6 = inlined_call_operand.hbm [shape: f32[256,128], index: 6, kind: output, shape index: {}]  }
   0x1   :  { %13 = vsyncpa [#allocation3 + $0x1], 0  ;;  %s2396_s21 = smov 0   ;;  %s2398_s22 = smov 0  }
   0x2   :  { %s2400_s23 = smov 0   ;;  %s2402_s24 = smov 0  }
   0x3 LB: > { %s2417_s25 = sadd.s32 4294967295, %s2353_s24   ;;  %s1719_s26 = sadd.s32 4294967294, %s2353_s24   ;;  %s2353_s24 = sphi %s2402_s24, %s2898_s24   ;;  %s2349_s23 = sphi %s2400_s23, %s2897_s23   ;;  %s2345_s22 = sphi %s2398_s22, %s2896_s22   ;;  %s2341_s21 = sphi %s2396_s21, %s2895_s21  }
   0x4   : > { %s2421_s27 = sadd.s32 1, %s2353_s24   ;;  %s157_s28 = sadd.s32 1, %s2349_s23 }
   0x5   : > { %s154_s29 = ssub.s32 %s2353_s24, %s2421_s27  ;;  %p167_p0 = scmp.ne.s32.totalorder %s2349_s23, %s2345_s22 }
   0x6   : > { %p155_p1 = scmp.eq.s32.totalorder %s154_s29, 0  ;;  %p168_p2 = scmp.eq.s32.totalorder %s2417_s25, 1 }
   0x7   : > { %p173_p3 = scmp.ne.s32.totalorder %s2345_s22, %s2341_s21  ;;  %p174_p4 = scmp.eq.s32.totalorder %s1719_s26, 1 }
   0x8   : > { %s2432_s30 = scalar_select %p155_p1, %s2349_s23, %s157_s28  }
   0x9   : > { %p2434_p5 = por %p168_p2, %p167_p0  ;;  %p2438_p6 = por %p174_p4, %p173_p3 }
   0xa   : > { %p1722_p7 = scmp.ge.s32.totalorder %s2353_s24, 1  ;;  %p216_p8 = scmp.lt.s32.totalorder %s2353_s24, 3 }
   0xc   : > { %p217_p9 = pnand %p1722_p7, %p216_p8 }
   0xd   : > { %s1724_s9 = sshll.u32 (!%p217_p9), %s2417_s25, 4  ;;  %v367_v0 = vld [vmem:[%s2887_s1] sm:$0xff] (!%p217_p9)  ;;  %v368_v1 = vld [vmem:[%s2887_s1 + $0x8] sm:$0xff] (!%p217_p9)  ;;  %v2355_v2 = vmov (!%p217_p9), 0   ;;  %v369_v8 = vld [vmem:[%s2887_s1 + $0x10] sm:$0xff] (!%p217_p9)  ;;  %v2356_v17 = vmov (!%p217_p9), 1   ;;  %v269_v24 = vlaneseq (!%p217_p9) }
   0xe   : > { %220 = sbr.rel (%p217_p9) target bundleno = 1218 (0x4c2), region = 44  ;;  %2221 = vset.pattern.permute.xlu1 (!%p217_p9), %v2355_v2  ;;  %2220 = vset.pattern.permute.xlu0 (!%p217_p9), %v2355_v2  ;;  %p247_p10 = scmp.lt.s32.totalorder (!%p217_p9), %s1724_s9, 31  ;;  %v2453_v3 = vpack.c.bf16 (!%p217_p9), %v368_v1, %v367_v0  ;;  %v370_v9 = vld [vmem:[%s2887_s1 + $0x18] sm:$0xff] (!%p217_p9)  ;;  %vm371_vm0 = vcmask (!%p217_p9), 261120   ;;  %v2357_v28 = vmov (!%p217_p9), 0.0  }
   0xf   : > { %v2476_v12 = vpack.c.bf16 (!%p217_p9), %v370_v9, %v369_v8  ;;  %v2495_v25 = vand.u32 (!%p217_p9), 127, %v269_v24  ;;  %s1829_s20 = sshll.u32 (!%p217_p9), %s2417_s25, 11  ;;  %s2358_s11 = smov (!%p217_p9), [#allocation2]  }
  0x10   : > { %2156 = vmatprep.subr.bf16.mxu1 (!%p217_p9), %v2453_v3  ;;  %2109 = vmatprep.subr.bf16.mxu0 (!%p217_p9), %v2453_v3  ;;  %s2295_s12 = sshll.u32 (!%p217_p9), %s2358_s11, 4  ;;  %s2296_s12 = int_to_ptr.vmem [resolvable:$false] %s2295_s12 }
  0x11   : > { %2158 = vmatpush3.bf16.msra.mxu1 (!%p217_p9), %v2453_v3  ;;  %2111 = vmatpush3.bf16.msra.mxu0 (!%p217_p9), %v2453_v3  ;;  %s2297_s13 = scalar_lea.vmem (!%p217_p9), %s2296_s12, 4096 }
  0x12   : > { %2157 = vmatprep.subr.bf16.mxu1 (!%p217_p9), %v2476_v12  ;;  %2113 = vmatprep.subr.bf16.mxu0 (!%p217_p9), %v2476_v12 }
  0x15   : > { %s2900_s9 = smov (!%p247_p10, %s1724_s9), 31  ;;  %2159 = vmatpush3.bf16.msra.mxu1 %v2476_v12  ;;  %2115 = vmatpush3.bf16.msra.mxu0 %v2476_v12 }
  0x16   : > { %s1725_s14 = sshll.u32 %s2900_s9, 3  ;;  %2117 = vmatprep.subr.bf16.mxu1 %v2453_v3  ;;  %s2836_s9 = scalar_lea.hbm %s2892_s6, %s1829_s20 }
  0x17   : > { %s2462_s17 = scalar_lea.vmem %s2886_s0, %s1725_s14 }
  0x18   : > { %v263_v4 = vld [vmem:[%s2462_s17 + $0x50] sm:$0xff]  ;;  %v261_v5 = vld [vmem:[%s2462_s17 + $0x40] sm:$0xff]  ;;  %v264_v6 = vld [vmem:[%s2462_s17 + $0x58] sm:$0xff] }
  0x19   : > { %302 = vperm.xlu1 %2221, %v263_v4   ;;  %296 = vperm.xlu0 %2220, %v261_v5   ;;  %v262_v7 = vld [vmem:[%s2462_s17 + $0x48] sm:$0xff]  ;;  %v265_v11 = vld [vmem:[%s2462_s17 + $0x60] sm:$0xff]  ;;  %v268_v13 = vld [vmem:[%s2462_s17 + $0x78] sm:$0xff] }
  0x1a   : > { %v266_v10 = vld [vmem:[%s2462_s17 + $0x68] sm:$0xff]  ;;  %v267_v14 = vld [vmem:[%s2462_s17 + $0x70] sm:$0xff]  ;;  %v253_v16 = vld [vmem:[%s2462_s17] sm:$0xff] }
  0x1b   : > { %v254_v15 = vld [vmem:[%s2462_s17 + $0x8] sm:$0xff]  ;;  %v255_v18 = vld [vmem:[%s2462_s17 + $0x10] sm:$0xff]  ;;  %v256_v19 = vld [vmem:[%s2462_s17 + $0x18] sm:$0xff] }
  0x1c   : > { %v257_v20 = vld [vmem:[%s2462_s17 + $0x20] sm:$0xff]  ;;  %v258_v21 = vld [vmem:[%s2462_s17 + $0x28] sm:$0xff]  ;;  %v259_v22 = vld [vmem:[%s2462_s17 + $0x30] sm:$0xff] }
  0x1d   : > { %305 = vperm.xlu1 %2221, %v264_v6   ;;  %299 = vperm.xlu0 %2220, %v262_v7   ;;  %v260_v23 = vld [vmem:[%s2462_s17 + $0x38] sm:$0xff]  ;;  %s243_s17 = sand.u32 1, %s2345_s22  }
  0x1e   : > { %s1723_s18 = sshll.u32 %s243_s17, 7  ;;  %s2845_s25 = scalar_lea.sflag [#allocation3], %s243_s17 }
  0x1f   : > { %s2802_s19 = scalar_lea.vmem [#allocation2], %s1723_s18 }
  0x20   : > { %s1657_s26 = sshll.u32 %s2802_s19, 4  ;;  %s2838_s26 = int_to_ptr.vmem [resolvable:$true] %s1657_s26 }
  0x21   : > { %311 = vperm.xlu1 %2221, %v266_v10   ;;  %308 = vperm.xlu0 %2220, %v265_v11   ;;  %s2291_s10 = scalar_lea.vmem %s2838_s26, 2048  ;;  %p2298_p0 = scmp.lt.s32.totalorder %s2838_s26, %s2296_s12 }
  0x22   : > { %p2292_p11 = scmp.ne.s32.totalorder %s2838_s26, %s2291_s10  ;;  %p2299_p1 = scmp.lt.s32.totalorder %s2297_s13, %s2291_s10 }
  0x24   : > { %p2293_p12 = pnand %p2292_p11, %p2434_p5  ;;  %p2300_p2 = por %p2299_p1, %p2298_p0 }
  0x25   : > { %317 = vperm.xlu1 %2221, %v268_v13   ;;  %314 = vperm.xlu0 %2220, %v267_v14  }
  0x26   : > { %p2294_p13 = pneg %p2293_p12 }
  0x28   : > { %p2301_p3 = pnand %p2300_p2, %p2294_p13 }
  0x29   : > { %2223 = vset.pattern.permute.xlu1 %v2356_v17  ;;  %2222 = vset.pattern.permute.xlu0 %v2356_v17 }
  0x2a   : > { %570 = vperm.xlu1 %2223, %v254_v15   ;;  %567 = vperm.xlu0 %2222, %v253_v16  }
  0x2e   : > { %573 = vperm.xlu1 %2223, %v255_v18   ;;  %576 = vperm.xlu0 %2222, %v256_v19  }
  0x32   : > { %579 = vperm.xlu1 %2223, %v257_v20   ;;  %582 = vperm.xlu0 %2222, %v258_v21  }
  0x36   : > { %585 = vperm.xlu1 %2223, %v259_v22   ;;  %588 = vperm.xlu0 %2222, %v260_v23  }
  0x3a   : > { %591 = vperm.xlu1 %2223, %v261_v5   ;;  %594 = vperm.xlu0 %2222, %v262_v7  }
  0x3e   : > { %597 = vperm.xlu1 %2223, %v263_v4   ;;  %600 = vperm.xlu0 %2222, %v264_v6  }
  0x42   : > { %603 = vperm.xlu1 %2223, %v265_v11   ;;  %606 = vperm.xlu0 %2222, %v266_v10  }
  0x46   : > { %609 = vperm.xlu1 %2223, %v267_v14   ;;  %612 = vperm.xlu0 %2222, %v268_v13  }
  0x4a   : > { %2224 = vset.pattern.permute.xlu1 %v2355_v2  ;;  %2225 = vset.pattern.permute.xlu0 %v2355_v2 }
  0x4b   : > { %272 = vperm.xlu1 %2224, %v253_v16   ;;  %275 = vperm.xlu0 %2225, %v254_v15  }
  0x4f   : > { %278 = vperm.xlu1 %2224, %v255_v18   ;;  %284 = vperm.xlu0 %2225, %v257_v20  }
  0x53   : > { %281 = vperm.xlu1 %2224, %v256_v19   ;;  %290 = vperm.xlu0 %2225, %v259_v22  }
  0x57   : > { %287 = vperm.xlu1 %2224, %v258_v21   ;;  %2226 = vset.pattern.permute.xlu0 %v2356_v17 }
  0x5b   : > { %293 = vperm.xlu1 %2224, %v260_v23  }
  0x98   : > { %v303_v26 = vpop.permute.xlu1 %302  ;;  %v297_v27 = vpop.permute.xlu0 %296 }
  0x99   : > { %vm327_vm1 = vcmp.eq.s32.totalorder %v2495_v25, %v297_v27  ;;  %vm329_vm2 = vcmp.eq.s32.totalorder %v2495_v25, %v303_v26 }
  0x9a   : > { %v1734_v29 = vsel %vm327_vm1, 1.0, %v2357_v28  ;;  %v1736_v33 = vsel %vm329_vm2, 1.0, %v2357_v28 }
  0x9b   : > { %1956 = vmatprep.mubr.msk.f32.mxu1 %vm371_vm0, %v1734_v29  ;;  %v855_v29 = vld [vmem:[%s2888_s2 + $0x8] sm:$0xff] }
  0x9c   : > { %v306_v30 = vpop.permute.xlu1 %305  ;;  %v300_v31 = vpop.permute.xlu0 %299  ;;  %2000 = vmatprep.subr.mxu0 %v855_v29 }
  0x9d   : > { %vm328_vm3 = vcmp.eq.s32.totalorder %v2495_v25, %v300_v31  ;;  %vm330_vm4 = vcmp.eq.s32.totalorder %v2495_v25, %v306_v30  ;;  %v565_v30 = vld [vmem:[%s2888_s2] sm:$0xff] }
  0x9e   : > { %v1735_v32 = vsel %vm328_vm3, 1.0, %v2357_v28  ;;  %v1737_v36 = vsel %vm330_vm4, 1.0, %v2357_v28  ;;  %v1282_v31 = vld [vmem:[%s2890_s4] sm:$0xff] }
  0x9f   : > { %1957 = vmatmul.mubr.msk.f32.vlgmr.msra.gmra.mrb[0].mxu1 %vm371_vm0, %v1735_v32  ;;  %v1284_v32 = vld [vmem:[%s2890_s4 + $0x10] sm:$0xff] }
  0xa0   : > { %v312_v34 = vpop.permute.xlu1 %311  ;;  %1959 = vmatprep.mubr.msk.f32.mxu1 %vm371_vm0, %v1736_v33  ;;  %2119 = vmatpush3.bf16.msra.mxu1 %v2453_v3  ;;  %v309_v35 = vpop.permute.xlu0 %308 }
  0xa1   : > { %vm331_vm5 = vcmp.eq.s32.totalorder %v2495_v25, %v309_v35  ;;  %2121 = vmatprep.subr.bf16.mxu1 %v2476_v12  ;;  %vm332_vm6 = vcmp.eq.s32.totalorder %v2495_v25, %v312_v34  ;;  %v1285_v34 = vld [vmem:[%s2890_s4 + $0x18] sm:$0xff] }
  0xa2   : > { %v1738_v37 = vsel %vm331_vm5, 1.0, %v2357_v28  ;;  %v1739_v40 = vsel %vm332_vm6, 1.0, %v2357_v28  ;;  %v2128_v35 = vpack.c.bf16 %v1285_v34, %v1284_v32 }
  0xa3   : > { %1960 = vmatmul.mubr.msk.f32.gmra.mrb[2].mxu1 %vm371_vm0, %v1737_v36  ;;  %v1286_v36 = vld [vmem:[%s2890_s4 + $0x20] sm:$0xff] }
  0xa4   : > { %v318_v38 = vpop.permute.xlu1 %317  ;;  %1962 = vmatprep.mubr.msk.f32.mxu1 %vm371_vm0, %v1738_v37  ;;  %v315_v39 = vpop.permute.xlu0 %314  ;;  %2123 = vmatpush3.bf16.msra.mxu1 %v2476_v12  ;;  %v1287_v37 = vld [vmem:[%s2890_s4 + $0x28] sm:$0xff] }
  0xa5   : > { %vm333_vm7 = vcmp.eq.s32.totalorder %v2495_v25, %v315_v39  ;;  %vm334_vm8 = vcmp.eq.s32.totalorder %v2495_v25, %v318_v38  ;;  %v2132_v38 = vpack.c.bf16 %v1287_v37, %v1286_v36  ;;  %v1288_v39 = vld [vmem:[%s2890_s4 + $0x30] sm:$0xff] }
  0xa6   : > { %v1740_v41 = vsel %vm333_vm7, 1.0, %v2357_v28  ;;  %v1741_v44 = vsel %vm334_vm8, 1.0, %v2357_v28 }
  0xa7   : > { %1963 = vmatmul.mubr.msk.f32.gmra.mrb[4].mxu1 %vm371_vm0, %v1739_v40  ;;  %v1289_v40 = vld [vmem:[%s2890_s4 + $0x38] sm:$0xff] }
  0xa8   : > { %1965 = vmatprep.mubr.msk.f32.mxu1 %vm371_vm0, %v1740_v41  ;;  %v2136_v41 = vpack.c.bf16 %v1289_v40, %v1288_v39 }
  0xa9   : > { %v571_v42 = vpop.permute.xlu1 %570  ;;  %v568_v43 = vpop.permute.xlu0 %567 }
  0xaa   : > { %vm614_vm9 = vcmp.eq.s32.totalorder %v2495_v25, %v568_v43  ;;  %vm615_vm10 = vcmp.eq.s32.totalorder %v2495_v25, %v571_v42  ;;  %v1290_v42 = vld [vmem:[%s2890_s4 + $0x40] sm:$0xff]  ;;  %v1291_v43 = vld [vmem:[%s2890_s4 + $0x48] sm:$0xff] }
  0xab   : > { %v1758_v45 = vsel %vm614_vm9, 1.0, %v2357_v28  ;;  %1966 = vmatmul.mubr.msk.f32.gmra.mrb[6].mxu1 %vm371_vm0, %v1741_v44  ;;  %v1759_v48 = vsel %vm615_vm10, 1.0, %v2357_v28  ;;  %v2140_v44 = vpack.c.bf16 %v1291_v43, %v1290_v42 }
  0xac   : > { %1976 = vmatprep.mubr.msk.f32.mxu1 %vm371_vm0, %v1758_v45  ;;  %v1292_v45 = vld [vmem:[%s2890_s4 + $0x50] sm:$0xff] }
  0xad   : > { %v574_v46 = vpop.permute.xlu1 %573  ;;  %v577_v47 = vpop.permute.xlu0 %576 }
  0xae   : > { %vm616_vm11 = vcmp.eq.s32.totalorder %v2495_v25, %v574_v46  ;;  %vm617_vm12 = vcmp.eq.s32.totalorder %v2495_v25, %v577_v47  ;;  %v1293_v46 = vld [vmem:[%s2890_s4 + $0x58] sm:$0xff] }
  0xaf   : > { %v1760_v49 = vsel %vm616_vm11, 1.0, %v2357_v28  ;;  %1977 = vmatmul.mubr.msk.f32.vlgmr.msra.gmra.mrb[8].mxu1 %vm371_vm0, %v1759_v48  ;;  %v1761_v52 = vsel %vm617_vm12, 1.0, %v2357_v28  ;;  %v2144_v47 = vpack.c.bf16 %v1293_v46, %v1292_v45  ;;  %v1294_v48 = vld [vmem:[%s2890_s4 + $0x60] sm:$0xff] }
  0xb0   : > { %1979 = vmatprep.mubr.msk.f32.mxu1 %vm371_vm0, %v1760_v49  ;;  %v1295_v49 = vld [vmem:[%s2890_s4 + $0x68] sm:$0xff] }
  0xb1   : > { %v580_v50 = vpop.permute.xlu1 %579  ;;  %v583_v51 = vpop.permute.xlu0 %582 }
  0xb2   : > { %vm618_vm13 = vcmp.eq.s32.totalorder %v2495_v25, %v580_v50  ;;  %vm619_vm14 = vcmp.eq.s32.totalorder %v2495_v25, %v583_v51  ;;  %v2148_v50 = vpack.c.bf16 %v1295_v49, %v1294_v48 }
  0xb3   : > { %v1762_v53 = vsel %vm618_vm13, 1.0, %v2357_v28  ;;  %1980 = vmatmul.mubr.msk.f32.gmra.mrb[10].mxu1 %vm371_vm0, %v1761_v52  ;;  %v1763_v56 = vsel %vm619_vm14, 1.0, %v2357_v28 }
  0xb4   : > { %1982 = vmatprep.mubr.msk.f32.mxu1 %vm371_vm0, %v1762_v53 }
  0xb5   : > { %v586_v54 = vpop.permute.xlu1 %585  ;;  %v589_v55 = vpop.permute.xlu0 %588 }
  0xb6   : > { %vm620_vm15 = vcmp.eq.s32.totalorder %v2495_v25, %v586_v54  ;;  %vm621_vm1 = vcmp.eq.s32.totalorder %v2495_v25, %v589_v55 }
  0xb7   : > { %v1764_v57 = vsel %vm620_vm15, 1.0, %v2357_v28  ;;  %1983 = vmatmul.mubr.msk.f32.gmra.mrb[12].mxu1 %vm371_vm0, %v1763_v56  ;;  %v1765_v60 = vsel %vm621_vm1, 1.0, %v2357_v28 }
  0xb8   : > { %1985 = vmatprep.mubr.msk.f32.mxu1 %vm371_vm0, %v1764_v57 }
  0xb9   : > { %v592_v58 = vpop.permute.xlu1 %591  ;;  %v595_v59 = vpop.permute.xlu0 %594 }
  0xba   : > { %vm622_vm2 = vcmp.eq.s32.totalorder %v2495_v25, %v592_v58  ;;  %vm623_vm3 = vcmp.eq.s32.totalorder %v2495_v25, %v595_v59 }
  0xbb   : > { %v1766_v61 = vsel %vm622_vm2, 1.0, %v2357_v28  ;;  %1986 = vmatmul.mubr.msk.f32.gmra.mrb[14].mxu1 %vm371_vm0, %v1765_v60  ;;  %v1767_v0 = vsel %vm623_vm3, 1.0, %v2357_v28  ;;  %vm1450_vm3 = vcmp.lt.s32.totalorder %v2495_v25, 32 }
  0xbc   : > { %1988 = vmatprep.mubr.msk.f32.mxu1 %vm371_vm0, %v1766_v61 }
  0xbd   : > { %v598_v62 = vpop.permute.xlu1 %597  ;;  %v601_v63 = vpop.permute.xlu0 %600 }
  0xbe   : > { %vm624_vm4 = vcmp.eq.s32.totalorder %v2495_v25, %v598_v62  ;;  %vm625_vm5 = vcmp.eq.s32.totalorder %v2495_v25, %v601_v63 }
  0xbf   : > { %v1768_v1 = vsel %vm624_vm4, 1.0, %v2357_v28  ;;  %1989 = vmatmul.mubr.msk.f32.gmra.mrb[16].mxu1 %vm371_vm0, %v1767_v0  ;;  %v1769_v4 = vsel %vm625_vm5, 1.0, %v2357_v28 }
  0xc0   : > { %1991 = vmatprep.mubr.msk.f32.mxu1 %vm371_vm0, %v1768_v1 }
  0xc1   : > { %v604_v2 = vpop.permute.xlu1 %603  ;;  %v607_v3 = vpop.permute.xlu0 %606 }
  0xc2   : > { %vm626_vm6 = vcmp.eq.s32.totalorder %v2495_v25, %v604_v2  ;;  %vm627_vm7 = vcmp.eq.s32.totalorder %v2495_v25, %v607_v3 }
  0xc3   : > { %v1770_v5 = vsel %vm626_vm6, 1.0, %v2357_v28  ;;  %1992 = vmatmul.mubr.msk.f32.gmra.mrb[18].mxu1 %vm371_vm0, %v1769_v4  ;;  %v1771_v8 = vsel %vm627_vm7, 1.0, %v2357_v28 }
  0xc4   : > { %1994 = vmatprep.mubr.msk.f32.mxu1 %vm371_vm0, %v1770_v5 }
  0xc5   : > { %v610_v6 = vpop.permute.xlu1 %609  ;;  %v613_v7 = vpop.permute.xlu0 %612 }
  0xc6   : > { %vm628_vm8 = vcmp.eq.s32.totalorder %v2495_v25, %v610_v6  ;;  %vm629_vm9 = vcmp.eq.s32.totalorder %v2495_v25, %v613_v7 }
  0xc7   : > { %v1772_v9 = vsel %vm628_vm8, 1.0, %v2357_v28  ;;  %1995 = vmatmul.mubr.msk.f32.gmra.mrb[20].mxu1 %vm371_vm0, %v1771_v8  ;;  %v1773_v10 = vsel %vm629_vm9, 1.0, %v2357_v28 }
  0xc8   : > { %1997 = vmatprep.mubr.msk.f32.mxu1 %vm371_vm0, %v1772_v9 }
  0xca   : > { %v273_v11 = vpop.permute.xlu1 %272  ;;  %v276_v12 = vpop.permute.xlu0 %275 }
  0xcb   : > { %vm319_vm10 = vcmp.eq.s32.totalorder %v2495_v25, %v273_v11  ;;  %vm320_vm11 = vcmp.eq.s32.totalorder %v2495_v25, %v276_v12  ;;  %1998 = vmatmul.mubr.msk.f32.gmra.mrb[22].mxu1 %vm371_vm0, %v1773_v10 }
  0xcc   : > { %v1727_v13 = vsel %vm320_vm11, 1.0, %v2357_v28  ;;  %v1726_v14 = vsel %vm319_vm10, 1.0, %v2357_v28 }
  0xcd   : > { %1944 = vmatprep.mubr.msk.f32.mxu0 %vm371_vm0, %v1726_v14 }
  0xce   : > { %v279_v15 = vpop.permute.xlu1 %278  ;;  %v285_v16 = vpop.permute.xlu0 %284  ;;  %1945 = vmatmul.mubr.msk.f32.vlgmr.msra.gmra.mrb[0].mxu0 %vm371_vm0, %v1727_v13 }
  0xcf   : > { %vm321_vm12 = vcmp.eq.s32.totalorder %v2495_v25, %v279_v15  ;;  %vm323_vm13 = vcmp.eq.s32.totalorder %v2495_v25, %v285_v16  ;;  %2001 = vmatpush3.msra.mxu0 %v855_v29 }
  0xd0   : > { %v1728_v17 = vsel %vm321_vm12, 1.0, %v2357_v28  ;;  %v1730_v21 = vsel %vm323_vm13, 1.0, %v2357_v28  ;;  %2026 = vmatprep.subr.mxu0 %v565_v30 }
  0xd1   : > { %1947 = vmatprep.mubr.msk.f32.mxu0 %vm371_vm0, %v1728_v17 }
  0xd2   : > { %v282_v18 = vpop.permute.xlu1 %281  ;;  %v291_v19 = vpop.permute.xlu0 %290 }
  0xd3   : > { %vm322_vm14 = vcmp.eq.s32.totalorder %v2495_v25, %v282_v18  ;;  %vm325_vm15 = vcmp.eq.s32.totalorder %v2495_v25, %v291_v19  ;;  %v1296_v19 = vld [vmem:[%s2890_s4 + $0x70] sm:$0xff] }
  0xd4   : > { %v1729_v20 = vsel %vm322_vm14, 1.0, %v2357_v28  ;;  %v1732_v24 = vsel %vm325_vm15, 1.0, %v2357_v28 }
  0xd5   : > { %1948 = vmatmul.mubr.msk.f32.gmra.mrb[2].mxu0 %vm371_vm0, %v1729_v20  ;;  %v1297_v20 = vld [vmem:[%s2890_s4 + $0x78] sm:$0xff] }
  0xd6   : > { %v288_v22 = vpop.permute.xlu1 %287  ;;  %1950 = vmatprep.mubr.msk.f32.mxu0 %vm371_vm0, %v1730_v21  ;;  %v2152_v21 = vpack.c.bf16 %v1297_v20, %v1296_v19 }
  0xd7   : > { %vm324_vm1 = vcmp.eq.s32.totalorder %v2495_v25, %v288_v22  ;;  %v1822_v22 = vld [vmem:[%s2889_s3] ss:$0 sm:$0xff] }
  0xd8   : > { %v1731_v23 = vsel %vm324_vm1, 1.0, %v2357_v28 }
  0xd9   : > { %1951 = vmatmul.mubr.msk.f32.gmra.mrb[4].mxu0 %vm371_vm0, %v1731_v23 }
  0xda   : > { %v294_v26 = vpop.permute.xlu1 %293  ;;  %1953 = vmatprep.mubr.msk.f32.mxu0 %vm371_vm0, %v1732_v24 }
  0xdb   : > { %vm326_vm2 = vcmp.eq.s32.totalorder %v2495_v25, %v294_v26 }
  0xdc   : > { %v1733_v27 = vsel %vm326_vm2, 1.0, %v2357_v28  ;;  %v1283_v28 = vld [vmem:[%s2890_s4 + $0x8] sm:$0xff] }
  0xdd   : > { %1954 = vmatmul.mubr.msk.f32.gmra.mrb[6].mxu0 %vm371_vm0, %v1733_v27  ;;  %v2124_v33 = vpack.c.bf16 %v1283_v28, %v1282_v31  ;;  %vm856_vm0 = vcmask 64512  }
  0xdf   : > { %2125 = vmatprep.subr.bf16.mxu1 %v2124_v33 }
  0xe0   : > { %2127 = vmatpush3.bf16.msra.mxu1 %v2124_v33 }
  0xe1   : > { %2129 = vmatprep.subr.bf16.mxu1 %v2128_v35 }
  0xe4   : > { %2131 = vmatpush3.bf16.msra.mxu1 %v2128_v35 }
  0xe5   : > { %2133 = vmatprep.subr.bf16.mxu1 %v2132_v38 }
  0xe8   : > { %2135 = vmatpush3.bf16.msra.mxu1 %v2132_v38 }
  0xe9   : > { %2137 = vmatprep.subr.bf16.mxu1 %v2136_v41 }
  0xec   : > { %2139 = vmatpush3.bf16.msra.mxu1 %v2136_v41 }
  0xed   : > { %2141 = vmatprep.subr.bf16.mxu1 %v2140_v44 }
  0xf0   : > { %2143 = vmatpush3.bf16.msra.mxu1 %v2140_v44 }
  0xf1   : > { %2145 = vmatprep.subr.bf16.mxu1 %v2144_v47 }
  0xf4   : > { %2147 = vmatpush3.bf16.msra.mxu1 %v2144_v47 }
  0xf5   : > { %2149 = vmatprep.subr.bf16.mxu1 %v2148_v50 }
  0xf8   : > { %2151 = vmatpush3.bf16.msra.mxu1 %v2148_v50 }
  0xf9   : > { %2153 = vmatprep.subr.bf16.mxu1 %v2152_v21 }
  0xfc   : > { %2155 = vmatpush3.bf16.msra.mxu1 %v2152_v21 }
 0x172   : > { %v1958_v51 = vpop.f32.mrb[0].mxu1 }
 0x173   : > { %v526_v52 = vpop.f32.mrb[1].mxu1 }
 0x176   : > { %v1961_v53 = vpop.f32.mrb[2].mxu1 }
 0x177   : > { %v536_v54 = vpop.f32.mrb[3].mxu1 }
 0x17a   : > { %v1964_v55 = vpop.f32.mrb[4].mxu1 }
 0x17b   : > { %v546_v56 = vpop.f32.mrb[5].mxu1 }
 0x17e   : > { %v1967_v57 = vpop.f32.mrb[6].mxu1 }
 0x17f   : > { %v556_v58 = vpop.f32.mrb[7].mxu1 }
 0x182   : > { %v1978_v59 = vpop.f32.mrb[8].mxu1 }
 0x183   : > { %v776_v60 = vpop.f32.mrb[9].mxu1 }
 0x184   : > { %2002 = vmatprep.mubr.msk.f32.mxu0 %vm856_vm0, %v776_v60 }
 0x185   : > { %2003 = vmatmul.mubr.msk.f32.vlgmr.msra.gmra.mrb[8].mxu0 %vm856_vm0, %v1978_v59 }
 0x186   : > { %v1981_v61 = vpop.f32.mrb[10].mxu1  ;;  %2027 = vmatpush3.msra.mxu0 %v565_v30 }
 0x187   : > { %v786_v62 = vpop.f32.mrb[11].mxu1 }
 0x188   : > { %2005 = vmatprep.mubr.msk.f32.mxu0 %vm856_vm0, %v786_v62 }
 0x189   : > { %2006 = vmatmul.mubr.msk.f32.gmra.mrb[10].mxu0 %vm856_vm0, %v1981_v61 }
 0x18a   : > { %v1984_v63 = vpop.f32.mrb[12].mxu1 }
 0x18b   : > { %v796_v0 = vpop.f32.mrb[13].mxu1 }
 0x18c   : > { %2008 = vmatprep.mubr.msk.f32.mxu0 %vm856_vm0, %v796_v0 }
 0x18d   : > { %2009 = vmatmul.mubr.msk.f32.gmra.mrb[12].mxu0 %vm856_vm0, %v1984_v63 }
 0x18e   : > { %v1987_v1 = vpop.f32.mrb[14].mxu1 }
 0x18f   : > { %v806_v2 = vpop.f32.mrb[15].mxu1 }
 0x190   : > { %2011 = vmatprep.mubr.msk.f32.mxu0 %vm856_vm0, %v806_v2 }
 0x191   : > { %2012 = vmatmul.mubr.msk.f32.gmra.mrb[14].mxu0 %vm856_vm0, %v1987_v1 }
 0x192   : > { %v1990_v3 = vpop.f32.mrb[16].mxu1 }
 0x193   : > { %v816_v4 = vpop.f32.mrb[17].mxu1 }
 0x194   : > { %2014 = vmatprep.mubr.msk.f32.mxu0 %vm856_vm0, %v816_v4 }
 0x195   : > { %2015 = vmatmul.mubr.msk.f32.gmra.mrb[16].mxu0 %vm856_vm0, %v1990_v3 }
 0x196   : > { %v1993_v5 = vpop.f32.mrb[18].mxu1 }
 0x197   : > { %v826_v6 = vpop.f32.mrb[19].mxu1 }
 0x198   : > { %2017 = vmatprep.mubr.msk.f32.mxu0 %vm856_vm0, %v826_v6 }
 0x199   : > { %2018 = vmatmul.mubr.msk.f32.gmra.mrb[18].mxu0 %vm856_vm0, %v1993_v5 }
 0x19a   : > { %v1996_v7 = vpop.f32.mrb[20].mxu1 }
 0x19b   : > { %v836_v8 = vpop.f32.mrb[21].mxu1 }
 0x19c   : > { %2020 = vmatprep.mubr.msk.f32.mxu0 %vm856_vm0, %v836_v8  ;;  %v1823_v8 = vld [vmem:[%s2891_s5] ss:$0 sm:$0xff] }
 0x19d   : > { %2021 = vmatmul.mubr.msk.f32.gmra.mrb[20].mxu0 %vm856_vm0, %v1996_v7 }
 0x19e   : > { %v1999_v9 = vpop.f32.mrb[22].mxu1 }
 0x19f   : > { %v846_v10 = vpop.f32.mrb[23].mxu1 }
 0x1a0   : > { %2023 = vmatprep.mubr.msk.f32.mxu0 %vm856_vm0, %v846_v10 }
 0x1a1   : > { %2024 = vmatmul.mubr.msk.f32.gmra.mrb[22].mxu0 %vm856_vm0, %v1999_v9  ;;  %v1946_v11 = vpop.f32.mrb[0].mxu0 }
 0x1a2   : > { %v486_v12 = vpop.f32.mrb[1].mxu0 }
 0x1a3   : > { %2028 = vmatprep.mubr.msk.f32.mxu0 %vm856_vm0, %v486_v12 }
 0x1a5   : > { %2029 = vmatmul.mubr.msk.f32.vlgmr.msra.gmra.mrb[8].mxu0 %vm856_vm0, %v1946_v11 }
 0x1a8   : > { %v1949_v13 = vpop.f32.mrb[2].mxu0 }
 0x1a9   : > { %v496_v14 = vpop.f32.mrb[3].mxu0 }
 0x1aa   : > { %2031 = vmatprep.mubr.msk.f32.mxu0 %vm856_vm0, %v496_v14 }
 0x1ab   : > { %2032 = vmatmul.mubr.msk.f32.gmra.mrb[10].mxu0 %vm856_vm0, %v1949_v13 }
 0x1ac   : > { %v1952_v15 = vpop.f32.mrb[4].mxu0 }
 0x1ad   : > { %v506_v16 = vpop.f32.mrb[5].mxu0 }
 0x1ae   : > { %2034 = vmatprep.mubr.msk.f32.mxu0 %vm856_vm0, %v506_v16 }
 0x1af   : > { %2035 = vmatmul.mubr.msk.f32.gmra.mrb[12].mxu0 %vm856_vm0, %v1952_v15 }
 0x1b0   : > { %v1955_v17 = vpop.f32.mrb[6].mxu0 }
 0x1b1   : > { %v516_v18 = vpop.f32.mrb[7].mxu0 }
 0x1b2   : > { %2037 = vmatprep.mubr.msk.f32.mxu0 %vm856_vm0, %v516_v18 }
 0x1b3   : > { %2038 = vmatmul.mubr.msk.f32.gmra.mrb[14].mxu0 %vm856_vm0, %v1955_v17 }
 0x1b4   : > { %2040 = vmatprep.mubr.msk.f32.mxu0 %vm856_vm0, %v526_v52 }
 0x1b7   : > { %2041 = vmatmul.mubr.msk.f32.gmra.mrb[16].mxu0 %vm856_vm0, %v1958_v51 }
 0x1b8   : > { %2043 = vmatprep.mubr.msk.f32.mxu0 %vm856_vm0, %v536_v54 }
 0x1bb   : > { %2044 = vmatmul.mubr.msk.f32.gmra.mrb[18].mxu0 %vm856_vm0, %v1961_v53 }
 0x1bc   : > { %2046 = vmatprep.mubr.msk.f32.mxu0 %vm856_vm0, %v546_v56 }
 0x1bf   : > { %2047 = vmatmul.mubr.msk.f32.gmra.mrb[20].mxu0 %vm856_vm0, %v1964_v55 }
 0x1c0   : > { %2049 = vmatprep.mubr.msk.f32.mxu0 %vm856_vm0, %v556_v58 }
 0x1c3   : > { %2050 = vmatmul.mubr.msk.f32.gmra.mrb[22].mxu0 %vm856_vm0, %v1967_v57 }
 0x278   : > { %v2030_v23 = vpop.f32.mrb[8].mxu0 }
 0x279   : > { %v1251_v24 = vadd.f32 %v2030_v23, %v1822_v22  ;;  %v1164_v26 = vpop.f32.mrb[9].mxu0 }
 0x27a   : > { %v1250_v27 = vadd.f32 %v1822_v22, %v1164_v26 }
 0x27b   : > { %v1267_v30 = vmax.f32 %v1251_v24, 0.0 }
 0x27c   : > { %v1266_v29 = vmax.f32 %v1250_v27, 0.0 }
 0x27e   : > { %v2033_v31 = vpop.f32.mrb[10].mxu0  ;;  %2084 = vmatprep.mubr.f32.mxu1 %v1266_v29 }
 0x27f   : > { %v1253_v28 = vadd.f32 %v2033_v31, %v1822_v22  ;;  %v1174_v32 = vpop.f32.mrb[11].mxu0  ;;  %2085 = vmatmul.mubr.f32.vlgmr.msra.gmra.mrb[24].mxu1 %v1267_v30 }
 0x280   : > { %v1252_v33 = vadd.f32 %v1822_v22, %v1174_v32 }
 0x281   : > { %v1269_v36 = vmax.f32 %v1253_v28, 0.0 }
 0x282   : > { %v1268_v34 = vmax.f32 %v1252_v33, 0.0  ;;  %v2036_v35 = vpop.f32.mrb[12].mxu0 }
 0x283   : > { %v1255_v37 = vadd.f32 %v2036_v35, %v1822_v22  ;;  %v1184_v38 = vpop.f32.mrb[13].mxu0 }
 0x284   : > { %v1254_v39 = vadd.f32 %v1822_v22, %v1184_v38  ;;  %2087 = vmatprep.mubr.f32.mxu1 %v1268_v34 }
 0x285   : > { %2088 = vmatmul.mubr.f32.gmra.mrb[26].mxu1 %v1269_v36  ;;  %v1271_v42 = vmax.f32 %v1255_v37, 0.0 }
 0x286   : > { %v1270_v40 = vmax.f32 %v1254_v39, 0.0  ;;  %v2039_v41 = vpop.f32.mrb[14].mxu0 }
 0x287   : > { %v1257_v43 = vadd.f32 %v2039_v41, %v1822_v22  ;;  %v1194_v44 = vpop.f32.mrb[15].mxu0 }
 0x288   : > { %v1256_v45 = vadd.f32 %v1822_v22, %v1194_v44  ;;  %2090 = vmatprep.mubr.f32.mxu1 %v1270_v40 }
 0x289   : > { %2091 = vmatmul.mubr.f32.gmra.mrb[28].mxu1 %v1271_v42  ;;  %v1273_v48 = vmax.f32 %v1257_v43, 0.0 }
 0x28a   : > { %v1272_v46 = vmax.f32 %v1256_v45, 0.0  ;;  %v2042_v47 = vpop.f32.mrb[16].mxu0 }
 0x28b   : > { %v1259_v49 = vadd.f32 %v2042_v47, %v1822_v22  ;;  %v1204_v50 = vpop.f32.mrb[17].mxu0 }
 0x28c   : > { %v1258_v51 = vadd.f32 %v1822_v22, %v1204_v50  ;;  %2093 = vmatprep.mubr.f32.mxu1 %v1272_v46 }
 0x28d   : > { %2094 = vmatmul.mubr.f32.gmra.mrb[30].mxu1 %v1273_v48  ;;  %v1275_v54 = vmax.f32 %v1259_v49, 0.0 }
 0x28e   : > { %v1274_v52 = vmax.f32 %v1258_v51, 0.0  ;;  %v2045_v53 = vpop.f32.mrb[18].mxu0 }
 0x28f   : > { %v1261_v55 = vadd.f32 %v2045_v53, %v1822_v22  ;;  %v1214_v56 = vpop.f32.mrb[19].mxu0 }
 0x290   : > { %v1260_v57 = vadd.f32 %v1822_v22, %v1214_v56  ;;  %2096 = vmatprep.mubr.f32.mxu1 %v1274_v52 }
 0x291   : > { %2097 = vmatmul.mubr.f32.gmra.mrb[32].mxu1 %v1275_v54  ;;  %v1277_v60 = vmax.f32 %v1261_v55, 0.0 }
 0x292   : > { %v1276_v58 = vmax.f32 %v1260_v57, 0.0  ;;  %v2048_v59 = vpop.f32.mrb[20].mxu0 }
 0x293   : > { %v1263_v61 = vadd.f32 %v2048_v59, %v1822_v22  ;;  %v1224_v62 = vpop.f32.mrb[21].mxu0 }
 0x294   : > { %v1262_v63 = vadd.f32 %v1822_v22, %v1224_v62  ;;  %2099 = vmatprep.mubr.f32.mxu1 %v1276_v58 }
 0x295   : > { %2100 = vmatmul.mubr.f32.gmra.mrb[34].mxu1 %v1277_v60  ;;  %v1279_v2 = vmax.f32 %v1263_v61, 0.0 }
 0x296   : > { %v1278_v0 = vmax.f32 %v1262_v63, 0.0  ;;  %v2051_v1 = vpop.f32.mrb[22].mxu0 }
 0x297   : > { %v1265_v3 = vadd.f32 %v2051_v1, %v1822_v22  ;;  %v1234_v4 = vpop.f32.mrb[23].mxu0 }
 0x298   : > { %v1264_v5 = vadd.f32 %v1822_v22, %v1234_v4  ;;  %2102 = vmatprep.mubr.f32.mxu1 %v1278_v0 }
 0x299   : > { %2103 = vmatmul.mubr.f32.gmra.mrb[36].mxu1 %v1279_v2  ;;  %v1281_v7 = vmax.f32 %v1265_v3, 0.0 }
 0x29a   : > { %v1280_v6 = vmax.f32 %v1264_v5, 0.0 }
 0x29c   : > { %2105 = vmatprep.mubr.f32.mxu1 %v1280_v6 }
 0x29d   : > { %2106 = vmatmul.mubr.f32.gmra.mrb[38].mxu1 %v1281_v7 }
 0x352   : > { %v2086_v9 = vpop.f32.mrb[24].mxu1 }
 0x353   : > { %v1377_v10 = vadd.f32 %v2086_v9, %v1823_v8  ;;  %v1371_v11 = vpop.f32.mrb[25].mxu1 }
 0x354   : > { %v1372_v12 = vadd.f32 %v1823_v8, %v1371_v11 }
 0x355   : > { %v1452_v13 = vsel %vm1450_vm3, %v1377_v10, -1e+30 }
 0x356   : > { %1469 = vmax.xlane.f32.xlu1 %v1452_v13  ;;  %v1451_v14 = vsel %vm1450_vm3, %v1372_v12, -1e+30 }
 0x357   : > { %1467 = vmax.xlane.f32.xlu0 %v1451_v14 }
 0x358   : > { %v2089_v15 = vpop.f32.mrb[26].mxu1 }
 0x359   : > { %v1387_v16 = vadd.f32 %v2089_v15, %v1823_v8  ;;  %v1381_v17 = vpop.f32.mrb[27].mxu1 }
 0x35a   : > { %v1382_v18 = vadd.f32 %v1823_v8, %v1381_v17 }
 0x35b   : > { %v1454_v19 = vsel %vm1450_vm3, %v1387_v16, -1e+30 }
 0x35c   : > { %1473 = vmax.xlane.f32.xlu0 %v1454_v19  ;;  %v2092_v20 = vpop.f32.mrb[28].mxu1  ;;  %v1453_v24 = vsel %vm1450_vm3, %v1382_v18, -1e+30 }
 0x35d   : > { %v1391_v21 = vpop.f32.mrb[29].mxu1  ;;  %v1397_v23 = vadd.f32 %v2092_v20, %v1823_v8 }
 0x35e   : > { %v1392_v22 = vadd.f32 %v1823_v8, %v1391_v21 }
 0x35f   : > { %v1456_v28 = vsel %vm1450_vm3, %v1397_v23, -1e+30 }
 0x360   : > { %1471 = vmax.xlane.f32.xlu0 %v1453_v24  ;;  %v2095_v26 = vpop.f32.mrb[30].mxu1  ;;  %v1455_v27 = vsel %vm1450_vm3, %v1392_v22, -1e+30 }
 0x361   : > { %1475 = vmax.xlane.f32.xlu1 %v1455_v27  ;;  %v1401_v29 = vpop.f32.mrb[31].mxu1  ;;  %v1407_v31 = vadd.f32 %v2095_v26, %v1823_v8 }
 0x362   : > { %v1402_v30 = vadd.f32 %v1823_v8, %v1401_v29 }
 0x363   : > { %v1458_v37 = vsel %vm1450_vm3, %v1407_v31, -1e+30 }
 0x364   : > { %1477 = vmax.xlane.f32.xlu0 %v1456_v28  ;;  %v2098_v32 = vpop.f32.mrb[32].mxu1  ;;  %v1457_v33 = vsel %vm1450_vm3, %v1402_v30, -1e+30 }
 0x365   : > { %1479 = vmax.xlane.f32.xlu1 %v1457_v33  ;;  %v1411_v34 = vpop.f32.mrb[33].mxu1  ;;  %v1417_v36 = vadd.f32 %v2098_v32, %v1823_v8 }
 0x366   : > { %v1412_v35 = vadd.f32 %v1823_v8, %v1411_v34 }
 0x367   : > { %v2709_v43 = vsel %vm1450_vm3, %v1417_v36, -1e+30 }
 0x368   : > { %1481 = vmax.xlane.f32.xlu0 %v1458_v37  ;;  %v2101_v38 = vpop.f32.mrb[34].mxu1  ;;  %v1459_v39 = vsel %vm1450_vm3, %v1412_v35, -1e+30 }
 0x369   : > { %1483 = vmax.xlane.f32.xlu1 %v1459_v39  ;;  %v1421_v40 = vpop.f32.mrb[35].mxu1  ;;  %v1427_v42 = vadd.f32 %v2101_v38, %v1823_v8 }
 0x36a   : > { %v1422_v41 = vadd.f32 %v1823_v8, %v1421_v40 }
 0x36b   : > { %v2719_v49 = vsel %vm1450_vm3, %v1427_v42, -1e+30 }
 0x36c   : > { %1485 = vmax.xlane.f32.xlu0 %v2709_v43  ;;  %v2104_v44 = vpop.f32.mrb[36].mxu1  ;;  %v2714_v45 = vsel %vm1450_vm3, %v1422_v41, -1e+30 }
 0x36d   : > { %1487 = vmax.xlane.f32.xlu1 %v2714_v45  ;;  %v1431_v46 = vpop.f32.mrb[37].mxu1  ;;  %v1437_v48 = vadd.f32 %v2104_v44, %v1823_v8 }
 0x36e   : > { %v1432_v47 = vadd.f32 %v1823_v8, %v1431_v46 }
 0x36f   : > { %v2729_v55 = vsel %vm1450_vm3, %v1437_v48, -1e+30 }
 0x370   : > { %1489 = vmax.xlane.f32.xlu0 %v2719_v49  ;;  %v2107_v50 = vpop.f32.mrb[38].mxu1  ;;  %v2724_v51 = vsel %vm1450_vm3, %v1432_v47, -1e+30 }
 0x371   : > { %1491 = vmax.xlane.f32.xlu1 %v2724_v51  ;;  %v1441_v52 = vpop.f32.mrb[39].mxu1  ;;  %v1447_v54 = vadd.f32 %v2107_v50, %v1823_v8 }
 0x372   : > { %v1442_v53 = vadd.f32 %v1823_v8, %v1441_v52 }
 0x373   : > { %v2739_v57 = vsel %vm1450_vm3, %v1447_v54, -1e+30 }
 0x374   : > { %1493 = vmax.xlane.f32.xlu0 %v2729_v55  ;;  %v2734_v56 = vsel %vm1450_vm3, %v1442_v53, -1e+30 }
 0x375   : > { %1495 = vmax.xlane.f32.xlu1 %v2734_v56 }
 0x378   : > { %1497 = vmax.xlane.f32.xlu0 %v2739_v57 }
 0x3e3   : > { %v1470_v58 = vpop.xlane.xlu1 %1469 }
 0x3e4   : > { %v2742_v59 = vsub.f32 %v1452_v13, %v1470_v58  ;;  %v1468_v60 = vpop.xlane.xlu0 %1467 }
 0x3e5   : > { %v2744_v61 = vsub.f32 %v1451_v14, %v1468_v60 }
 0x3e6   : > { %v1517_v62 = vmul.f32 1.442695, %v2742_v59 }
 0x3e7   : > { %v1515_v63 = vmul.f32 1.442695, %v2744_v61 }
 0x3e8   : > { %2227 = vpow2.f32 %v1517_v62 }
 0x3e9   : > { %2229 = vpow2.f32 %v1515_v63  ;;  %v1474_v0 = vpop.xlane.xlu0 %1473 }
 0x3ea   : > { %v2748_v1 = vsub.f32 %v1454_v19, %v1474_v0 }
 0x3ec   : > { %v1521_v25 = vmul.f32 1.442695, %v2748_v1 }
 0x3ed   : > { %v1472_v2 = vpop.xlane.xlu0 %1471 }
 0x3ee   : > { %2231 = vpow2.f32 %v1521_v25  ;;  %v2751_v3 = vsub.f32 %v1453_v24, %v1472_v2  ;;  %v1476_v4 = vpop.xlane.xlu1 %1475 }
 0x3ef   : > { %v2753_v5 = vsub.f32 %v1455_v27, %v1476_v4 }
 0x3f0   : > { %v1519_v6 = vmul.f32 1.442695, %v2751_v3 }
 0x3f1   : > { %v1523_v7 = vmul.f32 1.442695, %v2753_v5  ;;  %v1478_v8 = vpop.xlane.xlu0 %1477 }
 0x3f2   : > { %v2228_v9 = vpop.eup %2227  ;;  %2233 = vpow2.f32 %v1519_v6  ;;  %v2757_v10 = vsub.f32 %v1456_v28, %v1478_v8  ;;  %v1480_v11 = vpop.xlane.xlu1 %1479 }
 0x3f3   : > { %v2230_v12 = vpop.eup %2229  ;;  %v2759_v13 = vsub.f32 %v1457_v33, %v1480_v11  ;;  %1549 = vadd.xlane.f32.xlu0 %v2228_v9  ;;  %2235 = vpow2.f32 %v1523_v7 }
 0x3f4   : > { %v1525_v14 = vmul.f32 1.442695, %v2757_v10  ;;  %1547 = vadd.xlane.f32.xlu1 %v2230_v12 }
 0x3f5   : > { %v1527_v15 = vmul.f32 1.442695, %v2759_v13  ;;  %v1482_v16 = vpop.xlane.xlu0 %1481 }
 0x3f6   : > { %2237 = vpow2.f32 %v1525_v14  ;;  %v2763_v17 = vsub.f32 %v1458_v37, %v1482_v16  ;;  %v1484_v18 = vpop.xlane.xlu1 %1483 }
 0x3f7   : > { %v2765_v19 = vsub.f32 %v1459_v39, %v1484_v18  ;;  %2239 = vpow2.f32 %v1527_v15 }
 0x3f8   : > { %v2232_v20 = vpop.eup %2231  ;;  %v1529_v21 = vmul.f32 1.442695, %v2763_v17 }
 0x3f9   : > { %v1531_v22 = vmul.f32 1.442695, %v2765_v19  ;;  %v1486_v23 = vpop.xlane.xlu0 %1485  ;;  %1553 = vadd.xlane.f32.xlu0 %v2232_v20 }
 0x3fa   : > { %2241 = vpow2.f32 %v1529_v21  ;;  %v2770_v24 = vsub.f32 %v2709_v43, %v1486_v23  ;;  %v1488_v26 = vpop.xlane.xlu1 %1487 }
 0x3fb   : > { %v2773_v27 = vsub.f32 %v2714_v45, %v1488_v26  ;;  %2243 = vpow2.f32 %v1531_v22 }
 0x3fc   : > { %v2234_v29 = vpop.eup %2233  ;;  %v1533_v30 = vmul.f32 1.442695, %v2770_v24 }
 0x3fd   : > { %v1535_v31 = vmul.f32 1.442695, %v2773_v27  ;;  %v1490_v28 = vpop.xlane.xlu0 %1489  ;;  %1551 = vadd.xlane.f32.xlu1 %v2234_v29  ;;  %v2236_v34 = vpop.eup %2235 }
 0x3fe   : > { %2245 = vpow2.f32 %v1533_v30  ;;  %v2778_v32 = vsub.f32 %v2719_v49, %v1490_v28  ;;  %v1492_v33 = vpop.xlane.xlu1 %1491 }
 0x3ff   : > { %v2781_v35 = vsub.f32 %v2724_v51, %v1492_v33  ;;  %2247 = vpow2.f32 %v1535_v31 }
 0x400   : > { %v2238_v36 = vpop.eup %2237  ;;  %v1537_v37 = vmul.f32 1.442695, %v2778_v32 }
 0x401   : > { %v1539_v38 = vmul.f32 1.442695, %v2781_v35  ;;  %v1494_v39 = vpop.xlane.xlu0 %1493  ;;  %1557 = vadd.xlane.f32.xlu0 %v2238_v36  ;;  %1555 = vadd.xlane.f32.xlu1 %v2236_v34  ;;  %v2240_v42 = vpop.eup %2239 }
 0x402   : > { %2249 = vpow2.f32 %v1537_v37  ;;  %v2786_v40 = vsub.f32 %v2729_v55, %v1494_v39  ;;  %v1496_v41 = vpop.xlane.xlu1 %1495 }
 0x403   : > { %v2789_v43 = vsub.f32 %v2734_v56, %v1496_v41  ;;  %2251 = vpow2.f32 %v1539_v38 }
 0x404   : > { %v2242_v44 = vpop.eup %2241  ;;  %v1541_v45 = vmul.f32 1.442695, %v2786_v40 }
 0x405   : > { %v1543_v46 = vmul.f32 1.442695, %v2789_v43  ;;  %1561 = vadd.xlane.f32.xlu0 %v2242_v44  ;;  %v1498_v47 = vpop.xlane.xlu0 %1497  ;;  %1559 = vadd.xlane.f32.xlu1 %v2240_v42  ;;  %v2244_v49 = vpop.eup %2243 }
 0x406   : > { %2253 = vpow2.f32 %v1541_v45  ;;  %v2794_v48 = vsub.f32 %v2739_v57, %v1498_v47 }
 0x407   : > { %2255 = vpow2.f32 %v1543_v46 }
 0x408   : > { %v2246_v50 = vpop.eup %2245  ;;  %v1545_v51 = vmul.f32 1.442695, %v2794_v48 }
 0x409   : > { %1565 = vadd.xlane.f32.xlu0 %v2246_v50  ;;  %1563 = vadd.xlane.f32.xlu1 %v2244_v49  ;;  %v2248_v52 = vpop.eup %2247 }
 0x40a   : > { %2257 = vpow2.f32 %v1545_v51 }
 0x40c   : > { %v2250_v53 = vpop.eup %2249 }
 0x40d   : > { %1569 = vadd.xlane.f32.xlu0 %v2250_v53  ;;  %1567 = vadd.xlane.f32.xlu1 %v2248_v52  ;;  %v2252_v54 = vpop.eup %2251 }
 0x410   : > { %v2254_v55 = vpop.eup %2253 }
 0x411   : > { %1573 = vadd.xlane.f32.xlu0 %v2254_v55  ;;  %1571 = vadd.xlane.f32.xlu1 %v2252_v54  ;;  %v2256_v56 = vpop.eup %2255 }
 0x414   : > { %v2258_v57 = vpop.eup %2257 }
 0x415   : > { %1577 = vadd.xlane.f32.xlu0 %v2258_v57  ;;  %1575 = vadd.xlane.f32.xlu1 %v2256_v56 }
 0x480   : > { %v1550_v58 = vpop.xlane.xlu0 %1549 }
 0x481   : > { %2259 = vlog2.f32 %v1550_v58  ;;  %v1548_v60 = vpop.xlane.xlu1 %1547 }
 0x482   : > { %2261 = vlog2.f32 %v1548_v60 }
 0x486   : > { %v1554_v62 = vpop.xlane.xlu0 %1553 }
 0x487   : > { %2263 = vlog2.f32 %v1554_v62 }
 0x48a   : > { %v1552_v63 = vpop.xlane.xlu1 %1551 }
 0x48b   : > { %v2260_v0 = vpop.eup %2259  ;;  %2265 = vlog2.f32 %v1552_v63 }
 0x48c   : > { %v2262_v25 = vpop.eup %2261  ;;  %v1582_v2 = vmul.f32 0.6931472, %v2260_v0 }
 0x48d   : > { %v1580_v4 = vmul.f32 0.6931472, %v2262_v25 }
 0x48e   : > { %v1612_v6 = vsub.f32 %v2742_v59, %v1582_v2  ;;  %v1558_v7 = vpop.xlane.xlu0 %1557  ;;  %v1556_v8 = vpop.xlane.xlu1 %1555 }
 0x48f   : > { %v1611_v9 = vsub.f32 %v2744_v61, %v1580_v4  ;;  %2267 = vlog2.f32 %v1558_v7 }
 0x490   : > { %1628 = vst [vmem:[%s2802_s19 + $0x8] sm:$0xff] %v1612_v6  ;;  %2269 = vlog2.f32 %v1556_v8 }
 0x491   : > { %v2264_v11 = vpop.eup %2263  ;;  %1627 = vst [vmem:[%s2802_s19] sm:$0xff] %v1611_v9 }
 0x492   : > { %v1586_v12 = vmul.f32 0.6931472, %v2264_v11  ;;  %v1562_v14 = vpop.xlane.xlu0 %1561  ;;  %v1560_v15 = vpop.xlane.xlu1 %1559 }
 0x493   : > { %2271 = vlog2.f32 %v1562_v14 }
 0x494   : > { %v1614_v59 = vsub.f32 %v2748_v1, %v1586_v12  ;;  %2273 = vlog2.f32 %v1560_v15 }
 0x495   : > { %v2266_v16 = vpop.eup %2265 }
 0x496   : > { %1630 = vst [vmem:[%s2802_s19 + $0x18] sm:$0xff] %v1614_v59  ;;  %v1584_v61 = vmul.f32 0.6931472, %v2266_v16  ;;  %v1566_v18 = vpop.xlane.xlu0 %1565  ;;  %v1564_v20 = vpop.xlane.xlu1 %1563 }
 0x497   : > { %2275 = vlog2.f32 %v1566_v18 }
 0x498   : > { %v1613_v21 = vsub.f32 %v2751_v3, %v1584_v61  ;;  %2277 = vlog2.f32 %v1564_v20 }
 0x499   : > { %v2268_v22 = vpop.eup %2267 }
 0x49a   : > { %v2270_v23 = vpop.eup %2269  ;;  %1629 = vst [vmem:[%s2802_s19 + $0x10] sm:$0xff] %v1613_v21  ;;  %v1590_v26 = vmul.f32 0.6931472, %v2268_v22  ;;  %v1570_v29 = vpop.xlane.xlu0 %1569 }
 0x49b   : > { %v1568_v30 = vpop.xlane.xlu1 %1567  ;;  %v1588_v31 = vmul.f32 0.6931472, %v2270_v23  ;;  %2279 = vlog2.f32 %v1570_v29 }
 0x49c   : > { %v1616_v1 = vsub.f32 %v2757_v10, %v1590_v26  ;;  %2281 = vlog2.f32 %v1568_v30 }
 0x49d   : > { %v2272_v28 = vpop.eup %2271  ;;  %v1615_v33 = vsub.f32 %v2753_v5, %v1588_v31 }
 0x49e   : > { %v2274_v34 = vpop.eup %2273  ;;  %1632 = vst [vmem:[%s2802_s19 + $0x28] sm:$0xff] %v1616_v1  ;;  %v1594_v3 = vmul.f32 0.6931472, %v2272_v28  ;;  %v1574_v36 = vpop.xlane.xlu0 %1573 }
 0x49f   : > { %v1572_v37 = vpop.xlane.xlu1 %1571  ;;  %1631 = vst [vmem:[%s2802_s19 + $0x20] sm:$0xff] %v1615_v33  ;;  %v1592_v38 = vmul.f32 0.6931472, %v2274_v34  ;;  %2283 = vlog2.f32 %v1574_v36 }
 0x4a0   : > { %v1618_v39 = vsub.f32 %v2763_v17, %v1594_v3  ;;  %2285 = vlog2.f32 %v1572_v37 }
 0x4a1   : > { %v2276_v41 = vpop.eup %2275  ;;  %v1617_v10 = vsub.f32 %v2759_v13, %v1592_v38 }
 0x4a2   : > { %v2278_v42 = vpop.eup %2277  ;;  %1634 = vst [vmem:[%s2802_s19 + $0x38] sm:$0xff] %v1618_v39  ;;  %v1598_v5 = vmul.f32 0.6931472, %v2276_v41  ;;  %v1578_v44 = vpop.xlane.xlu0 %1577 }
 0x4a3   : > { %v1576_v45 = vpop.xlane.xlu1 %1575  ;;  %1633 = vst [vmem:[%s2802_s19 + $0x30] sm:$0xff] %v1617_v10  ;;  %v1596_v46 = vmul.f32 0.6931472, %v2278_v42  ;;  %2287 = vlog2.f32 %v1578_v44 }
 0x4a4   : > { %v1620_v47 = vsub.f32 %v2770_v24, %v1598_v5  ;;  %2289 = vlog2.f32 %v1576_v45 }
 0x4a5   : > { %v2280_v17 = vpop.eup %2279  ;;  %v1619_v49 = vsub.f32 %v2765_v19, %v1596_v46 }
 0x4a6   : > { %v2282_v50 = vpop.eup %2281  ;;  %1636 = vst [vmem:[%s2802_s19 + $0x48] sm:$0xff] %v1620_v47  ;;  %v1602_v13 = vmul.f32 0.6931472, %v2280_v17 }
 0x4a7   : > { %1635 = vst [vmem:[%s2802_s19 + $0x40] sm:$0xff] %v1619_v49  ;;  %v1600_v51 = vmul.f32 0.6931472, %v2282_v50 }
 0x4a8   : > { %v1622_v52 = vsub.f32 %v2778_v32, %v1602_v13 }
 0x4a9   : > { %v2284_v53 = vpop.eup %2283  ;;  %v1621_v54 = vsub.f32 %v2773_v27, %v1600_v51 }
 0x4aa   : > { %v2286_v55 = vpop.eup %2285  ;;  %1638 = vst [vmem:[%s2802_s19 + $0x58] sm:$0xff] %v1622_v52  ;;  %v1606_v24 = vmul.f32 0.6931472, %v2284_v53 }
 0x4ab   : > { %1637 = vst [vmem:[%s2802_s19 + $0x50] sm:$0xff] %v1621_v54  ;;  %v1604_v19 = vmul.f32 0.6931472, %v2286_v55 }
 0x4ac   : > { %v1624_v56 = vsub.f32 %v2786_v40, %v1606_v24 }
 0x4ad   : > { %v2288_v57 = vpop.eup %2287  ;;  %v1623_v58 = vsub.f32 %v2781_v35, %v1604_v19 }
 0x4ae   : > { %v2290_v32 = vpop.eup %2289  ;;  %1640 = vst [vmem:[%s2802_s19 + $0x68] sm:$0xff] %v1624_v56  ;;  %v1610_v60 = vmul.f32 0.6931472, %v2288_v57 }
 0x4af   : > { %1639 = vst [vmem:[%s2802_s19 + $0x60] sm:$0xff] %v1623_v58  ;;  %v1608_v27 = vmul.f32 0.6931472, %v2290_v32 }
 0x4b0   : > { %v1626_v62 = vsub.f32 %v2794_v48, %v1610_v60 }
 0x4b1   : > { %v1625_v35 = vsub.f32 %v2789_v43, %v1608_v27 }
 0x4b2   : > { %1642 = vst [vmem:[%s2802_s19 + $0x78] sm:$0xff] %v1626_v62 }
 0x4b3   : > { %1641 = vst [vmem:[%s2802_s19 + $0x70] sm:$0xff] %v1625_v35 }
 0x4b4   : > { %2304 = shalt.err (!%p2301_p3)
}
 0x4b5   : > { %s2305_s14 = scalar_lea.hbm %s2836_s9, 2048  ;;  %s2309_s17 = scalar_lea.hbm %s2892_s6, 4096 }
 0x4b6   : > { %p2306_p4 = scmp.ne.s32.totalorder %s2836_s9, %s2305_s14  ;;  %p2310_p9 = scmp.lt.u32.totalorder %s2836_s9, %s2892_s6 }
 0x4b7   : > { %p2311_p10 = scmp.lt.u32.totalorder %s2309_s17, %s2305_s14  ;;  %p2313_p12 = scmp.lt.u32.totalorder %s2305_s14, %s2836_s9 }
 0x4b8   : > { %p2307_p7 = pnand %p2306_p4, %p2434_p5 }
 0x4b9   : > { %p2312_p11 = por %p2311_p10, %p2310_p9 }
 0x4ba   : > { %p2308_p8 = pneg %p2307_p7 }
 0x4bb   : > { %p2314_p13 = por %p2313_p12, %p2312_p11 }
 0x4bd   : > { %p2315_p0 = pnand %p2314_p13, %p2308_p8 }
 0x4bf   : > { %2318 = shalt.err (!%p2315_p0)
}
 0x4c0   : > { %s2359_s20 = smov 128   ;;  %s2360_s28 = smov 8  }
 0x4c1   : > { %2176 = dma.vmem_to_hbm [thread:$0]  (%p2434_p5), %s2838_s26, 2048, %s2836_s9, %s2845_s25, %s2359_s20, %s2359_s20, %s2360_s28  }
 0x4c2 PF: > { %p2182_p1 = scmp.ge.s32.totalorder %s2353_s24, 2  ;;  %s1672_s29 = sand.u32 1, %s2341_s21  }
 0x4c3   : > { %s1673_s10 = scalar_lea.sflag [#allocation3], %s1672_s29 }
 0x4c4   : > { %p2179_p2 = pnand %p2182_p1, %p2438_p6 }
 0x4c6   : > { %2336 = dma.done.wait (!%p2179_p2), %s1673_s10, 2048  }
 0x4c7   : > { %2338 = vsyncadd (!%p2179_p2), %s1673_s10, 4294965248  ;;  %p16_p3 = scmp.ge.s32.totalorder %s2421_s27, 4   ;;  %s2895_s21 = smov %s2345_s22 }
 0x4c8   : > { %s2896_s22 = smov %s2349_s23  ;;  %s2897_s23 = smov %s2432_s30 }
 0x4c9   : > { %s2898_s24 = smov %s2421_s27  ;;  %18 = sbr.rel (!%p16_p3) target bundleno = 3 (0x3), region = 79 }
 0x4d0   :  { %1678 = vsyncpa [#allocation3], 1 }
 0x4d1   :  { %1680 = vsyncpa [#allocation3 + $0x1], 1 }

</bundles_post_ra>
